<compile_context>
chip_gen: v6e
topology: v6e:2x2x1
jax: 0.10.0
libtpu: 0.0.40
codegen_flags: <defaults>
</compile_context>

<pallas_src>
import jax
import jax.numpy as jnp
from jax.experimental import pallas as pl
from jax.experimental.pallas import tpu as pltpu  # noqa: F401  (TPU backend)

D_PAD = 128  # lane-dense padding for the input_dim (=2) feature axis


def rnn_fused_kernel(z_ref, w_in_ref, b_h_ref, w_out_ref, b_out_ref,
                     out_ref, h1_ref):
    # z_ref:     (B, K)   K = D_PAD + H, z = [x zero-padded to D_PAD | h0]
    # w_in_ref:  (K, H)   [W_ih^T zero-padded to D_PAD rows ; W_hh^T]
    # b_h_ref:   (1, H)   b_ih + b_hh
    # w_out_ref: (H, Dp)  W_lin^T zero-padded to Dp = D_PAD lanes
    # b_out_ref: (1, Dp)  b_lin zero-padded
    # out_ref:   (B, Dp)  lane-dense output (caller slices [:, :input_dim])
    # h1_ref:    (B, H)   final hidden state
    z = z_ref[...]

    # Single fused MXU matmul for the recurrent pre-activation.
    pre = (jnp.dot(z, w_in_ref[...], preferred_element_type=jnp.float32)
           + b_h_ref[...])
    h1 = jnp.tanh(pre)                                        # (B, H)

    out = (jnp.dot(h1, w_out_ref[...], preferred_element_type=jnp.float32)
           + b_out_ref[...])                                  # (B, Dp)

    h1_ref[...] = h1.astype(h1_ref.dtype)
    out_ref[...] = out.astype(out_ref.dtype)


def _full(shape):
    # grid=() -> index_map takes no grid indices; full-array block.
    return pl.BlockSpec(shape, lambda: (0,) * len(shape))


def rnn_forward(x, h0, params):
    """x: (B, D) f32, h0: (B, H) f32. Returns (out (B, D), h1 (B, H))."""
    B, D = x.shape
    H = h0.shape[1]
    w_in, b_h, w_out_p, b_out_p = params
    K = w_in.shape[0]          # D_PAD + H
    Dp = w_out_p.shape[1]      # D_PAD

    # Build the fused, lane-dense input [x_pad | h0] in the wrapper.
    x_pad = jnp.pad(x, ((0, 0), (0, (K - H) - D)))
    z = jnp.concatenate([x_pad, h0], axis=1)                  # (B, K)

    out_pad, h1 = pl.pallas_call(
        rnn_fused_kernel,
        out_shape=(
            jax.ShapeDtypeStruct((B, Dp), jnp.float32),
            jax.ShapeDtypeStruct((B, H), jnp.float32),
        ),
        grid=(),
        in_specs=[
            _full((B, K)),
            _full((K, H)),
            _full((1, H)),
            _full((H, Dp)),
            _full((1, Dp)),
        ],
        out_specs=(
            _full((B, Dp)),
            _full((B, H)),
        ),
    )(z, w_in, b_h, w_out_p, b_out_p)

    return out_pad[:, :D], h1


def init_params(key, input_dim, n_latent):
    """Deterministic param init (PyTorch shapes; uniform(-k, k)); returns
    (kernel-ready params, raw PyTorch-layout params)."""
    k_rnn = 1.0 / jnp.sqrt(n_latent)
    k_lin = 1.0 / jnp.sqrt(n_latent)
    ks = jax.random.split(key, 6)
    w_ih = jax.random.uniform(ks[0], (n_latent, input_dim), jnp.float32, -k_rnn, k_rnn)
    w_hh = jax.random.uniform(ks[1], (n_latent, n_latent), jnp.float32, -k_rnn, k_rnn)
    b_ih = jax.random.uniform(ks[2], (n_latent,), jnp.float32, -k_rnn, k_rnn)
    b_hh = jax.random.uniform(ks[3], (n_latent,), jnp.float32, -k_rnn, k_rnn)
    w_lin = jax.random.uniform(ks[4], (input_dim, n_latent), jnp.float32, -k_lin, k_lin)
    b_lin = jax.random.uniform(ks[5], (input_dim,), jnp.float32, -k_lin, k_lin)

    # Fused / padded kernel-side parameters.
    wih_t_pad = jnp.zeros((D_PAD, n_latent), jnp.float32).at[:input_dim, :].set(w_ih.T)
    w_in = jnp.concatenate([wih_t_pad, w_hh.T], axis=0)        # (D_PAD + H, H)
    b_h = (b_ih + b_hh).reshape(1, -1)                         # (1, H)
    w_out_p = jnp.zeros((n_latent, D_PAD), jnp.float32).at[:, :input_dim].set(w_lin.T)
    b_out_p = jnp.zeros((1, D_PAD), jnp.float32).at[0, :input_dim].set(b_lin)

    kernel_params = (w_in, b_h, w_out_p, b_out_p)
    raw = (w_ih, w_hh, b_ih, b_hh, w_lin, b_lin)
    return kernel_params, raw


def reference_forward(x, h0, raw):
    w_ih, w_hh, b_ih, b_hh, w_lin, b_lin = raw
    h1 = jnp.tanh(x @ w_ih.T + b_ih + h0 @ w_hh.T + b_hh)
    out = h1 @ w_lin.T + b_lin
    return out, h1


if __name__ == "__main__":
    B, D, H = 8, 2, 128
    key = jax.random.PRNGKey(0)
    kx, kh, kp = jax.random.split(key, 3)

    x = jax.random.normal(kx, (B, D), jnp.float32)
    h0 = jax.random.normal(kh, (B, H), jnp.float32)
    params, raw = init_params(kp, D, H)

    out, h1 = rnn_forward(x, h0, params)
    out, h1 = jax.block_until_ready((out, h1))

    ref_out, ref_h1 = reference_forward(x, h0, raw)
    assert out.shape == (B, D) and h1.shape == (B, H)
    assert jnp.allclose(out, ref_out, atol=1e-5, rtol=1e-5)
    assert jnp.allclose(h1, ref_h1, atol=1e-5, rtol=1e-5)

    print("KERNEL_OK")
</pallas_src>

<mosaic_0001>
module attributes {stable_mosaic.version = 11 : i64} {
  func.func @rnn_fused_kernel(%arg0: memref<8x256xf32, #tpu.memory_space<vmem>>, %arg1: memref<256x128xf32, #tpu.memory_space<vmem>>, %arg2: memref<1x128xf32, #tpu.memory_space<vmem>>, %arg3: memref<128x128xf32, #tpu.memory_space<vmem>>, %arg4: memref<1x128xf32, #tpu.memory_space<vmem>>, %arg5: memref<8x128xf32, #tpu.memory_space<vmem>>, %arg6: memref<8x128xf32, #tpu.memory_space<vmem>>) attributes {dimension_semantics = [], scalar_prefetch = 0 : i64, scratch_operands = 0 : i64, tpu.core_type = #tpu.core_type<tc>} {
    %c0 = arith.constant 0 : index
    %c0_0 = arith.constant 0 : index
    %0 = vector.load %arg0[%c0, %c0_0] : memref<8x256xf32, #tpu.memory_space<vmem>>, vector<8x256xf32>
    %c0_1 = arith.constant 0 : index
    %c0_2 = arith.constant 0 : index
    %1 = vector.load %arg1[%c0_1, %c0_2] : memref<256x128xf32, #tpu.memory_space<vmem>>, vector<256x128xf32>
    %cst = arith.constant dense<0.000000e+00> : vector<8x128xf32>
    %2 = tpu.matmul %0, %1, %cst {dimension_numbers = #tpu.dot_dimension_numbers<[1], [0], [0], [1], [0, 0, 1, 1], [], []>} : vector<8x256xf32>, vector<256x128xf32>, vector<8x128xf32> -> vector<8x128xf32>
    %c0_3 = arith.constant 0 : index
    %c0_4 = arith.constant 0 : index
    %3 = vector.load %arg2[%c0_3, %c0_4] : memref<1x128xf32, #tpu.memory_space<vmem>>, vector<1x128xf32>
    %4 = vector.broadcast %3 : vector<1x128xf32> to vector<8x128xf32>
    %5 = arith.addf %2, %4 : vector<8x128xf32>
    %6 = math.tanh %5 : vector<8x128xf32>
    %c0_5 = arith.constant 0 : index
    %c0_6 = arith.constant 0 : index
    %7 = vector.load %arg3[%c0_5, %c0_6] : memref<128x128xf32, #tpu.memory_space<vmem>>, vector<128x128xf32>
    %cst_7 = arith.constant dense<0.000000e+00> : vector<8x128xf32>
    %8 = tpu.matmul %6, %7, %cst_7 {dimension_numbers = #tpu.dot_dimension_numbers<[1], [0], [0], [1], [0, 0, 1, 1], [], []>} : vector<8x128xf32>, vector<128x128xf32>, vector<8x128xf32> -> vector<8x128xf32>
    %c0_8 = arith.constant 0 : index
    %c0_9 = arith.constant 0 : index
    %9 = vector.load %arg4[%c0_8, %c0_9] : memref<1x128xf32, #tpu.memory_space<vmem>>, vector<1x128xf32>
    %10 = vector.broadcast %9 : vector<1x128xf32> to vector<8x128xf32>
    %11 = arith.addf %8, %10 : vector<8x128xf32>
    %c0_10 = arith.constant 0 : index
    %c0_11 = arith.constant 0 : index
    %12 = vector.load %arg6[%c0_10, %c0_11] : memref<8x128xf32, #tpu.memory_space<vmem>>, vector<8x128xf32>
    tpu.vector_store %arg6[%c0_10, %c0_11], %6 {strides = array<i32>} : memref<8x128xf32, #tpu.memory_space<vmem>>, vector<8x128xf32>,
    %c0_12 = arith.constant 0 : index
    %c0_13 = arith.constant 0 : index
    %13 = vector.load %arg5[%c0_12, %c0_13] : memref<8x128xf32, #tpu.memory_space<vmem>>, vector<8x128xf32>
    tpu.vector_store %arg5[%c0_12, %c0_13], %11 {strides = array<i32>} : memref<8x128xf32, #tpu.memory_space<vmem>>, vector<8x128xf32>,
    return
  }
}

</mosaic_0001>

<bundles_post_ra>
// kernel: tpu_custom_call.1
= control target key start
LH: loop header
LB: loop body
LE: loop exit
PB: predicated region body
PF: predicated region fallthrough
CT: control target
= control target key end

     0   :  { %12 = vsyncpa [#allocation3], 0  ;;  %s590_s0 = inlined_call_operand.hbm [shape: f32[8,256], index: 0, kind: input, shape index: {}]   ;;  %s591_s1 = inlined_call_operand.hbm [shape: f32[256,128], index: 1, kind: input, shape index: {}]   ;;  %s592_s2 = inlined_call_operand.vmem [shape: f32[1,128], index: 2, kind: input, shape index: {}]   ;;  %s593_s3 = inlined_call_operand.hbm [shape: f32[128,128], index: 3, kind: input, shape index: {}]   ;;  %s594_s4 = inlined_call_operand.vmem [shape: f32[1,128], index: 4, kind: input, shape index: {}]   ;;  %s595_s5 = inlined_call_operand.hbm [shape: f32[8,128], index: 5, kind: output, shape index: {0}]   ;;  %s596_s6 = inlined_call_operand.hbm [shape: f32[8,128], index: 6, kind: output, shape index: {1}]  }
   0x1   :  { %13 = vsyncpa [#allocation6], 0 }
   0x2   :  { %14 = vsyncpa [#allocation4], 0 }
   0x3   :  { %15 = vsyncpa [#allocation10], 0  ;;  %s508_s21 = smov [#allocation5]  }
   0x4   :  { %s31_s22 = sshll.u32 %s508_s21, 4  ;;  %s32_s22 = int_to_ptr.vmem [resolvable:$true] %s31_s22 }
   0x5   :  { %s408_s23 = scalar_lea.vmem %s32_s22, 4096  ;;  %p413_p1 = scmp.lt.s32.totalorder %s32_s22, %s32_s22 }
   0x6   :  { %p409_p0 = scmp.ne.s32.totalorder %s32_s22, %s408_s23  ;;  %p414_p2 = scmp.lt.s32.totalorder %s408_s23, %s408_s23 }
   0x8   :  { %p415_p3 = por %p414_p2, %p413_p1 }
   0xa   :  { %p416_p4 = pnand %p415_p3, %p409_p0 }
   0xc   :  { %419 = shalt.err (!%p416_p4)
}
   0xd   :  { %s509_s24 = smov 128   ;;  %s510_s25 = smov 8  }
   0xe   :  { %37 = dma.hbm_to_vmem [thread:$0]  %s591_s1, 4096, %s32_s22, [#allocation6], %s509_s24, %s509_s24, %s510_s25  }
   0xf   :  { %s511_s28 = smov [#allocation2]   ;;  %s512_s30 = smov [#allocation7]  }
  0x10   :  { %s22_s29 = sshll.u32 %s511_s28, 4  ;;  %s45_s7 = sshll.u32 %s512_s30, 4  ;;  %s23_s29 = int_to_ptr.vmem [resolvable:$true] %s22_s29  ;;  %s46_s7 = int_to_ptr.vmem [resolvable:$true] %s45_s7 }
  0x11   :  { %s428_s8 = scalar_lea.vmem %s23_s29, 256  ;;  %p433_p6 = scmp.lt.s32.totalorder %s23_s29, %s23_s29 }
  0x12   :  { %p429_p5 = scmp.ne.s32.totalorder %s23_s29, %s428_s8  ;;  %p434_p7 = scmp.lt.s32.totalorder %s428_s8, %s428_s8 }
  0x14   :  { %p435_p8 = por %p434_p7, %p433_p6 }
  0x16   :  { %p436_p9 = pnand %p435_p8, %p429_p5 }
  0x18   :  { %439 = shalt.err (!%p436_p9)
}
  0x19   :  { %25 = dma.hbm_to_vmem [thread:$0]  %s590_s0, 256, %s23_s29, [#allocation3]  }
  0x1a   :  { %s448_s11 = scalar_lea.vmem %s46_s7, 2048  ;;  %p453_p11 = scmp.lt.s32.totalorder %s46_s7, %s46_s7 }
  0x1b   :  { %p449_p10 = scmp.ne.s32.totalorder %s46_s7, %s448_s11  ;;  %p454_p12 = scmp.lt.s32.totalorder %s448_s11, %s448_s11 }
  0x1d   :  { %p455_p13 = por %p454_p12, %p453_p11 }
  0x1f   :  { %p456_p0 = pnand %p455_p13, %p449_p10 }
  0x21   :  { %459 = shalt.err (!%p456_p0)
}
  0x22   :  { %51 = dma.hbm_to_vmem [thread:$0]  %s593_s3, 2048, %s46_s7, [#allocation6], %s509_s24, %s509_s24, %s510_s25  }
  0x23   :  { %500 = dma.done.wait [#allocation3], 256  }
  0x24   :  { %501 = vsyncadd [#allocation3], 4294967040 }
  0x25   :  { %502 = dma.done.wait [#allocation6], 6144  }
  0x26   :  { %503 = vsyncadd [#allocation6], 4294961152  ;;  %v513_v0 = vmov 0.0   ;;  %v96_v1 = vld [vmem:[#allocation5 + $0xf8] sm:$0xff]  ;;  %v95_v3 = vld [vmem:[#allocation5 + $0xf0] sm:$0xff]  ;;  %vm514_vm0 = vmmov 0  }
  0x27   :  { %354 = vmatprep.subr.mxu1 %v513_v0  ;;  %v80_v2 = vld [vmem:[#allocation5 + $0x78] sm:$0xff]  ;;  %302 = vmatprep.subr.mxu0 %v96_v1  ;;  %v79_v4 = vld [vmem:[#allocation5 + $0x70] sm:$0xff]  ;;  %v94_v5 = vld [vmem:[#allocation5 + $0xe8] sm:$0xff]  ;;  %s515_s13 = smov [#allocation9]  }
  0x28   :  { %303 = vmatpush3.msra.mxu0 %v80_v2  ;;  %v78_v6 = vld [vmem:[#allocation5 + $0x68] sm:$0xff]  ;;  %v93_v7 = vld [vmem:[#allocation5 + $0xe0] sm:$0xff]  ;;  %v92_v9 = vld [vmem:[#allocation5 + $0xd8] sm:$0xff]  ;;  %386 = vmatprep.mubr.msk.f32.mxu1 %vm514_vm0, %v513_v0  ;;  %s286_s14 = sshll.u32 %s515_s13, 4  ;;  %s287_s14 = int_to_ptr.vmem [resolvable:$true] %s286_s14 }
  0x29   :  { %304 = vmatprep.subr.mxu0 %v95_v3  ;;  %v77_v8 = vld [vmem:[#allocation5 + $0x60] sm:$0xff]  ;;  %v76_v10 = vld [vmem:[#allocation5 + $0x58] sm:$0xff]  ;;  %v91_v11 = vld [vmem:[#allocation5 + $0xd0] sm:$0xff]  ;;  %s460_s15 = scalar_lea.vmem %s287_s14, 128  ;;  %p465_p2 = scmp.lt.s32.totalorder %s287_s14, %s287_s14 }
  0x2a   :  { %305 = vmatpush3.msra.mxu0 %v79_v4  ;;  %v75_v12 = vld [vmem:[#allocation5 + $0x50] sm:$0xff]  ;;  %v90_v13 = vld [vmem:[#allocation5 + $0xc8] sm:$0xff]  ;;  %v64_v14 = vld [vmem:[#allocation2 + $0x8] sm:$0xff]  ;;  %p461_p1 = scmp.ne.s32.totalorder %s287_s14, %s460_s15  ;;  %p466_p3 = scmp.lt.s32.totalorder %s460_s15, %s460_s15 }
  0x2b   :  { %306 = vmatprep.subr.mxu0 %v94_v5  ;;  %v74_v15 = vld [vmem:[#allocation5 + $0x48] sm:$0xff]  ;;  %168 = vmatprep.mubr.f32.mxu0 %v64_v14  ;;  %v190_v16 = vld [vmem:[#allocation7 + $0x78] sm:$0xff]  ;;  %v189_v17 = vld [vmem:[#allocation7 + $0x70] sm:$0xff] }
  0x2c   :  { %307 = vmatpush3.msra.mxu0 %v78_v6  ;;  %v89_v18 = vld [vmem:[#allocation5 + $0xc0] sm:$0xff]  ;;  %355 = vmatpush3.msra.mxu1 %v190_v16  ;;  %v188_v20 = vld [vmem:[#allocation7 + $0x68] sm:$0xff]  ;;  %v88_v21 = vld [vmem:[#allocation5 + $0xb8] sm:$0xff]  ;;  %p467_p4 = por %p466_p3, %p465_p2 }
  0x2d   :  { %308 = vmatprep.subr.mxu0 %v93_v7  ;;  %v73_v19 = vld [vmem:[#allocation5 + $0x40] sm:$0xff]  ;;  %356 = vmatprep.subr.mxu1 %v513_v0  ;;  %v72_v22 = vld [vmem:[#allocation5 + $0x38] sm:$0xff]  ;;  %v87_v24 = vld [vmem:[#allocation5 + $0xb0] sm:$0xff] }
  0x2e   :  { %309 = vmatpush3.msra.mxu0 %v77_v8  ;;  %357 = vmatpush3.msra.mxu1 %v189_v17  ;;  %v187_v23 = vld [vmem:[#allocation7 + $0x60] sm:$0xff]  ;;  %v71_v25 = vld [vmem:[#allocation5 + $0x30] sm:$0xff]  ;;  %v186_v26 = vld [vmem:[#allocation7 + $0x58] sm:$0xff]  ;;  %p468_p5 = pnand %p467_p4, %p461_p1 }
  0x2f   :  { %310 = vmatprep.subr.mxu0 %v92_v9  ;;  %358 = vmatprep.subr.mxu1 %v513_v0  ;;  %v86_v27 = vld [vmem:[#allocation5 + $0xa8] sm:$0xff]  ;;  %v85_v29 = vld [vmem:[#allocation5 + $0xa0] sm:$0xff]  ;;  %v84_v31 = vld [vmem:[#allocation5 + $0x98] sm:$0xff] }
  0x30   :  { %311 = vmatpush3.msra.mxu0 %v76_v10  ;;  %359 = vmatpush3.msra.mxu1 %v188_v20  ;;  %v70_v28 = vld [vmem:[#allocation5 + $0x28] sm:$0xff]  ;;  %v69_v30 = vld [vmem:[#allocation5 + $0x20] sm:$0xff]  ;;  %v68_v32 = vld [vmem:[#allocation5 + $0x18] sm:$0xff] }
  0x31   :  { %312 = vmatprep.subr.mxu0 %v91_v11  ;;  %360 = vmatprep.subr.mxu1 %v513_v0  ;;  %v83_v33 = vld [vmem:[#allocation5 + $0x90] sm:$0xff]  ;;  %v82_v35 = vld [vmem:[#allocation5 + $0x88] sm:$0xff]  ;;  %v81_v37 = vld [vmem:[#allocation5 + $0x80] sm:$0xff] }
  0x32   :  { %313 = vmatpush3.msra.mxu0 %v75_v12  ;;  %361 = vmatpush3.msra.mxu1 %v187_v23  ;;  %v67_v34 = vld [vmem:[#allocation5 + $0x10] sm:$0xff]  ;;  %v66_v36 = vld [vmem:[#allocation5 + $0x8] sm:$0xff]  ;;  %v65_v38 = vld [vmem:[#allocation5] sm:$0xff] }
  0x33   :  { %314 = vmatprep.subr.mxu0 %v90_v13  ;;  %362 = vmatprep.subr.mxu1 %v513_v0  ;;  %v63_v39 = vld [vmem:[#allocation2] sm:$0xff]  ;;  %v184_v41 = vld [vmem:[#allocation7 + $0x48] sm:$0xff]  ;;  %v183_v42 = vld [vmem:[#allocation7 + $0x40] sm:$0xff] }
  0x34   :  { %315 = vmatpush3.msra.mxu0 %v74_v15  ;;  %363 = vmatpush3.msra.mxu1 %v186_v26  ;;  %v185_v40 = vld [vmem:[#allocation7 + $0x50] sm:$0xff]  ;;  %v182_v43 = vld [vmem:[#allocation7 + $0x38] sm:$0xff]  ;;  %v180_v45 = vld [vmem:[#allocation7 + $0x28] sm:$0xff] }
  0x35   :  { %316 = vmatprep.subr.mxu0 %v89_v18  ;;  %364 = vmatprep.subr.mxu1 %v513_v0  ;;  %v181_v44 = vld [vmem:[#allocation7 + $0x30] sm:$0xff]  ;;  %v179_v46 = vld [vmem:[#allocation7 + $0x20] sm:$0xff]  ;;  %v178_v47 = vld [vmem:[#allocation7 + $0x18] sm:$0xff] }
  0x36   :  { %317 = vmatpush3.msra.mxu0 %v73_v19  ;;  %365 = vmatpush3.msra.mxu1 %v185_v40  ;;  %v177_v48 = vld [vmem:[#allocation7 + $0x10] sm:$0xff]  ;;  %v176_v49 = vld [vmem:[#allocation7 + $0x8] sm:$0xff]  ;;  %v175_v50 = vld [vmem:[#allocation7] sm:$0xff] }
  0x37   :  { %318 = vmatprep.subr.mxu0 %v88_v21  ;;  %366 = vmatprep.subr.mxu1 %v513_v0  ;;  %v300_v52 = vld [vmem:[%s592_s2] ss:$0 sm:$0xff] }
  0x38   :  { %319 = vmatpush3.msra.mxu0 %v72_v22  ;;  %367 = vmatpush3.msra.mxu1 %v184_v41 }
  0x39   :  { %320 = vmatprep.subr.mxu0 %v87_v24  ;;  %368 = vmatprep.subr.mxu1 %v513_v0 }
  0x3a   :  { %321 = vmatpush3.msra.mxu0 %v71_v25  ;;  %369 = vmatpush3.msra.mxu1 %v183_v42 }
  0x3b   :  { %322 = vmatprep.subr.mxu0 %v86_v27  ;;  %370 = vmatprep.subr.mxu1 %v513_v0 }
  0x3c   :  { %323 = vmatpush3.msra.mxu0 %v70_v28  ;;  %371 = vmatpush3.msra.mxu1 %v182_v43 }
  0x3d   :  { %324 = vmatprep.subr.mxu0 %v85_v29  ;;  %372 = vmatprep.subr.mxu1 %v513_v0 }
  0x3e   :  { %325 = vmatpush3.msra.mxu0 %v69_v30  ;;  %373 = vmatpush3.msra.mxu1 %v181_v44 }
  0x3f   :  { %326 = vmatprep.subr.mxu0 %v84_v31  ;;  %374 = vmatprep.subr.mxu1 %v513_v0 }
  0x40   :  { %327 = vmatpush3.msra.mxu0 %v68_v32  ;;  %375 = vmatpush3.msra.mxu1 %v180_v45 }
  0x41   :  { %328 = vmatprep.subr.mxu0 %v83_v33  ;;  %376 = vmatprep.subr.mxu1 %v513_v0 }
  0x42   :  { %329 = vmatpush3.msra.mxu0 %v67_v34  ;;  %377 = vmatpush3.msra.mxu1 %v179_v46 }
  0x43   :  { %330 = vmatprep.subr.mxu0 %v82_v35  ;;  %378 = vmatprep.subr.mxu1 %v513_v0 }
  0x44   :  { %331 = vmatpush3.msra.mxu0 %v66_v36  ;;  %379 = vmatpush3.msra.mxu1 %v178_v47 }
  0x45   :  { %332 = vmatprep.subr.mxu0 %v81_v37  ;;  %380 = vmatprep.subr.mxu1 %v513_v0 }
  0x46   :  { %333 = vmatpush3.msra.mxu0 %v65_v38  ;;  %381 = vmatpush3.msra.mxu1 %v177_v48 }
  0x47   :  { %169 = vmatmul.mubr.f32.vlgmr.msra.gmra.mxu0 %v63_v39  ;;  %382 = vmatprep.subr.mxu1 %v513_v0 }
  0x48   :  { %383 = vmatpush3.msra.mxu1 %v176_v49 }
  0x49   :  { %384 = vmatprep.subr.mxu1 %v513_v0 }
  0x4a   :  { %385 = vmatpush3.msra.mxu1 %v175_v50 }
 0x107   :  { %v334_v51 = vpop.f32.mrf.mxu0 }
 0x109   :  { %v335_v53 = vpop.f32.mrf.mxu0 }
 0x10a   :  { %v336_v54 = vadd.f32 %v335_v53, %v334_v51 }
 0x10c   :  { %v171_v55 = vadd.f32 %v336_v54, %v300_v52 }
 0x10e   :  { %398 = vtanh.f32 %v171_v55 }
 0x11b   :  { %v399_v56 = vpop.eup %398 }
 0x11c   :  { %268 = vst [vmem:[#allocation9] sm:$0xff] %v399_v56  ;;  %387 = vmatmul.mubr.f32.vlgmr.msra.gmra.mxu1 %v399_v56 }
 0x11d   :  { %471 = shalt.err (!%p468_p5)
}
 0x11e   :  { %289 = dma.vmem_to_hbm [thread:$0]  %s287_s14, 128, %s596_s6, [#allocation10]   ;;  %v301_v57 = vld [vmem:[%s594_s4] ss:$0 sm:$0xff] }
 0x11f   :  { %s516_s19 = smov [#allocation8]  }
 0x120   :  { %s276_s20 = sshll.u32 %s516_s19, 4  ;;  %s277_s20 = int_to_ptr.vmem [resolvable:$true] %s276_s20 }
 0x121   :  { %s480_s21 = scalar_lea.vmem %s277_s20, 128  ;;  %p485_p7 = scmp.lt.s32.totalorder %s277_s20, %s277_s20 }
 0x122   :  { %p481_p6 = scmp.ne.s32.totalorder %s277_s20, %s480_s21  ;;  %p486_p8 = scmp.lt.s32.totalorder %s480_s21, %s480_s21 }
 0x124   :  { %p487_p9 = por %p486_p8, %p485_p7 }
 0x126   :  { %p488_p10 = pnand %p487_p9, %p481_p6 }
 0x1dc   :  { %v264_v58 = vpop.f32.mrf.mxu1 }
 0x1dd   :  { %v265_v59 = vadd.f32 %v301_v57, %v264_v58 }
 0x1de   :  { %v388_v60 = vpop.f32.mrf.mxu1 }
 0x1df   :  { %269 = vst [vmem:[#allocation8] sm:$0xff] %v265_v59 }
 0x1e0   :  { %491 = shalt.err (!%p488_p10)
}
 0x1e1   :  { %279 = dma.vmem_to_hbm [thread:$0]  %s277_s20, 128, %s595_s5, [#allocation4]  }
 0x1e2   :  { %504 = dma.done.wait [#allocation4], 128  }
 0x1e3   :  { %505 = vsyncadd [#allocation4], 4294967168 }
 0x1e4   :  { %506 = dma.done.wait [#allocation10], 128  }
 0x1e5   :  { %507 = vsyncadd [#allocation10], 4294967168 }
 0x1e6   :  { %296 = vsyncpa [#allocation3], 1 }
 0x1e7   :  { %297 = vsyncpa [#allocation6], 1 }
 0x1e8   :  { %298 = vsyncpa [#allocation4], 1 }
 0x1e9   :  { %299 = vsyncpa [#allocation10], 1 }

</bundles_post_ra>
